<compile_context>
chip_gen: v7x
topology: tpu7x:2x2x1
jax: 0.10.0
libtpu: 0.0.40
codegen_flags: <defaults>
</compile_context>

<pallas_src>
import jax
import jax.numpy as jnp
from jax import lax
from jax.experimental import pallas as pl
from jax.experimental.pallas import tpu as pltpu

# Padded-lane bias value: exp(_NEG_BIG - m) underflows to exactly 0, so the
# padded output columns contribute nothing to the softmax denominator.
_NEG_BIG = -1.0e30


def attention_softmax_kernel(x_ref, w_ref, b_ref, o_ref):
    # x_ref: (tm, D)      native dtype (f32 / bf16)
    # w_ref: (O_pad, D)   native dtype, PyTorch nn.Linear layout (no transpose)
    # b_ref: (1, O_pad)   f32 (padded lanes hold _NEG_BIG)
    # o_ref: (tm, O_pad)
    x = x_ref[...]
    w = w_ref[...]

    # Linear: contract x's dim 1 against w's dim 1 (== x @ w.T) on the MXU.
    # Operands stay in native precision; MXU accumulates in f32.
    logits = lax.dot_general(
        x, w,
        dimension_numbers=(((1,), (1,)), ((), ())),
        preferred_element_type=jnp.float32,
    ) + b_ref[...]                                       # (tm, O_pad) f32

    # Numerically-stable softmax along dim=1 (the out_dim axis), in f32.
    m = jnp.max(logits, axis=1, keepdims=True)
    e = jnp.exp(logits - m)
    denom = jnp.sum(e, axis=1, keepdims=True)
    # approx=True -> EUP vrcp, co-issues with the VPU exp/mul work.
    o_ref[...] = (e * pl.reciprocal(denom, approx=True)).astype(o_ref.dtype)


def attention_layer(x, weight, bias, *, block_rows=512):
    """softmax(x @ weight.T + bias, axis=1)  — matches AttentionLayer.forward.

    x:      (B, D)  activations
    weight: (O, D)  PyTorch nn.Linear layout (not transposed on the host)
    bias:   (O,)
    """
    B, D = x.shape
    O = weight.shape[0]

    # ---- lane-dense output axis: pad O up to a multiple of 128 -------------
    # Padded weight rows are zero and the padded bias is a huge negative
    # number, so padded logits vanish after exp and never perturb the softmax
    # over the real columns. (In a real model this padding would be
    # precomputed once, not rebuilt per call.)
    O_pad = max(128, ((O + 127) // 128) * 128)
    w_p = jnp.pad(weight.astype(x.dtype), ((0, O_pad - O), (0, 0)))
    b_p = jnp.pad(bias.astype(jnp.float32), (0, O_pad - O),
                  constant_values=_NEG_BIG).reshape(1, O_pad)

    # ---- batch tiling -------------------------------------------------------
    tm = max(8, min(block_rows, B))
    tm = (tm // 8) * 8                       # sublane multiple
    B_pad = pl.cdiv(B, tm) * tm
    x_p = x if B_pad == B else jnp.pad(x, ((0, B_pad - B), (0, 0)))

    # NOTE: D (=input_dim) is kept whole per block; if it ever scales past a
    # few thousand, add a K grid axis (tk multiple of 256 on v6e/v7x, 128 on
    # v5e) with an f32 VMEM accumulator and pl.when init/finalize. If O_pad
    # grows past what fits per tile, switch to an online (flash-style)
    # softmax over O tiles.
    out = pl.pallas_call(
        attention_softmax_kernel,
        out_shape=jax.ShapeDtypeStruct((B_pad, O_pad), x.dtype),
        grid_spec=pltpu.PrefetchScalarGridSpec(
            num_scalar_prefetch=0,
            grid=(B_pad // tm,),
            in_specs=[
                pl.BlockSpec((tm, D), lambda i: (i, 0)),      # activation tile
                pl.BlockSpec((O_pad, D), lambda i: (0, 0)),   # resident weight
                pl.BlockSpec((1, O_pad), lambda i: (0, 0)),   # resident bias
            ],
            out_specs=pl.BlockSpec((tm, O_pad), lambda i: (i, 0)),
        ),
        # Batch axis is embarrassingly parallel -> sharded across both
        # TensorCores on v7x; harmless on single-TC v5e/v6e.
        compiler_params=pltpu.CompilerParams(
            dimension_semantics=("parallel",)),
    )(x_p, w_p, b_p)

    # Drop row/lane padding (kernel stores themselves stay full-lane-width).
    return out[:B, :O]


if __name__ == "__main__":
    key = jax.random.PRNGKey(0)
    k_x, k_w, k_b, k_x2 = jax.random.split(key, 4)

    # Shapes implied by FormulaLayer: input_dim = len(attributes_tuple),
    # out_dim = len(formula_list).
    batch, input_dim, out_dim = 8, 32, 16

    x = jax.random.normal(k_x, (batch, input_dim), dtype=jnp.float32)
    weight = jax.random.normal(k_w, (out_dim, input_dim), dtype=jnp.float32) * 0.1
    bias = jax.random.normal(k_b, (out_dim,), dtype=jnp.float32) * 0.1

    out = attention_layer(x, weight, bias)
    jax.block_until_ready(out)

    ref = jax.nn.softmax(x @ weight.T + bias, axis=1)
    assert out.shape == (batch, out_dim)
    assert jnp.allclose(out, ref, atol=2e-3, rtol=2e-3), \
        float(jnp.max(jnp.abs(out - ref)))

    # Larger bf16 check: exercises the batch-tiled grid (grid=(2,), tm=512)
    # and the native-precision MXU path.
    B2 = 1024
    x2 = jax.random.normal(k_x2, (B2, input_dim), dtype=jnp.bfloat16)
    w_bf16 = weight.astype(jnp.bfloat16)
    out2 = attention_layer(x2, w_bf16, bias, block_rows=512)
    jax.block_until_ready(out2)

    ref2 = jax.nn.softmax(
        x2.astype(jnp.float32) @ w_bf16.astype(jnp.float32).T + bias, axis=1)
    assert out2.shape == (B2, out_dim)
    assert jnp.allclose(out2.astype(jnp.float32), ref2, atol=2e-2, rtol=2e-2)

    print("KERNEL_OK")
</pallas_src>

<mosaic_0001>
module attributes {stable_mosaic.version = 11 : i64} {
  func.func @attention_softmax_kernel(%arg0: i32, %arg1: memref<8x32xf32, #tpu.memory_space<vmem>>, %arg2: memref<128x32xf32, #tpu.memory_space<vmem>>, %arg3: memref<1x128xf32, #tpu.memory_space<vmem>>, %arg4: memref<8x128xf32, #tpu.memory_space<vmem>>) attributes {dimension_semantics = [#tpu.dimension_semantics<parallel>], iteration_bounds = array<i64: 1>, scalar_prefetch = 0 : i64, scratch_operands = 0 : i64, tpu.core_type = #tpu.core_type<tc>, window_params = [{transform_indices = @transform_0, window_bounds = array<i64: 8, 32>}, {pipeline_mode = #tpu.pipeline_mode<synchronous>, transform_indices = @transform_1, window_bounds = array<i64: 128, 32>}, {pipeline_mode = #tpu.pipeline_mode<synchronous>, transform_indices = @transform_2, window_bounds = array<i64: 1, 128>}, {transform_indices = @transform_3, window_bounds = array<i64: 8, 128>}]} {
    %c0 = arith.constant 0 : index
    %c0_0 = arith.constant 0 : index
    %0 = vector.load %arg1[%c0, %c0_0] : memref<8x32xf32, #tpu.memory_space<vmem>>, vector<8x32xf32>
    %c0_1 = arith.constant 0 : index
    %c0_2 = arith.constant 0 : index
    %1 = vector.load %arg2[%c0_1, %c0_2] : memref<128x32xf32, #tpu.memory_space<vmem>>, vector<128x32xf32>
    %cst = arith.constant dense<0.000000e+00> : vector<8x128xf32>
    %2 = tpu.matmul %0, %1, %cst {dimension_numbers = #tpu.dot_dimension_numbers<[1], [1], [0], [0], [0, 0, 1, 0], [], []>} : vector<8x32xf32>, vector<128x32xf32>, vector<8x128xf32> -> vector<8x128xf32>
    %c0_3 = arith.constant 0 : index
    %c0_4 = arith.constant 0 : index
    %3 = vector.load %arg3[%c0_3, %c0_4] : memref<1x128xf32, #tpu.memory_space<vmem>>, vector<1x128xf32>
    %4 = vector.broadcast %3 : vector<1x128xf32> to vector<8x128xf32>
    %5 = arith.addf %2, %4 : vector<8x128xf32>
    %cst_5 = arith.constant dense<0xFF800000> : vector<8xf32>
    %6 = vector.multi_reduction <maximumf>, %5, %cst_5 [1] : vector<8x128xf32> to vector<8xf32>
    %7 = vector.shape_cast %6 : vector<8xf32> to vector<8x1xf32>
    %8 = vector.broadcast %7 : vector<8x1xf32> to vector<8x128xf32>
    %9 = arith.subf %5, %8 : vector<8x128xf32>
    %10 = math.exp %9 : vector<8x128xf32>
    %cst_6 = arith.constant dense<0.000000e+00> : vector<8xf32>
    %11 = vector.multi_reduction <add>, %10, %cst_6 [1] : vector<8x128xf32> to vector<8xf32>
    %12 = vector.shape_cast %11 : vector<8xf32> to vector<8x1xf32>
    %13 = tpu.reciprocal %12 {approx = true} : vector<8x1xf32> -> vector<8x1xf32>
    %14 = vector.broadcast %13 : vector<8x1xf32> to vector<8x128xf32>
    %15 = arith.mulf %10, %14 : vector<8x128xf32>
    %c0_7 = arith.constant 0 : index
    %c0_8 = arith.constant 0 : index
    %16 = vector.load %arg4[%c0_7, %c0_8] : memref<8x128xf32, #tpu.memory_space<vmem>>, vector<8x128xf32>
    tpu.vector_store %arg4[%c0_7, %c0_8], %15 {strides = array<i32>} : memref<8x128xf32, #tpu.memory_space<vmem>>, vector<8x128xf32>,
    return
  }
  func.func @transform_0(%arg0: i32) -> (i32, i32) {
    %c0_i32 = arith.constant 0 : i32
    %c0_i32_0 = arith.constant 0 : i32
    return %arg0, %c0_i32 : i32, i32
  }
  func.func @transform_1(%arg0: i32) -> (i32, i32) {
    %c0_i32 = arith.constant 0 : i32
    %c0_i32_0 = arith.constant 0 : i32
    %c0_i32_1 = arith.constant 0 : i32
    return %c0_i32, %c0_i32_0 : i32, i32
  }
  func.func @transform_2(%arg0: i32) -> (i32, i32) {
    %c0_i32 = arith.constant 0 : i32
    %c0_i32_0 = arith.constant 0 : i32
    %c0_i32_1 = arith.constant 0 : i32
    return %c0_i32, %c0_i32_0 : i32, i32
  }
  func.func @transform_3(%arg0: i32) -> (i32, i32) {
    %c0_i32 = arith.constant 0 : i32
    %c0_i32_0 = arith.constant 0 : i32
    return %arg0, %c0_i32 : i32, i32
  }
}

</mosaic_0001>

<bundles_post_ra>
// kernel: tpu_custom_call.1
= control target key start
LH: loop header
LB: loop body
LE: loop exit
PB: predicated region body
PF: predicated region fallthrough
CT: control target
= control target key end

     0   :  { %vm39_vm0 = vcmask 261120   ;;  %v319_v2 = vmov 0.0|0.0   ;;  %vm320_vm2 = vmmov 0   ;;  %v321_v5 = vmov 0.0   ;;  %s432_s0 = inlined_call_operand.vmem [shape: f32[8,32], index: 0, kind: input, shape index: {}]   ;;  %s433_s1 = inlined_call_operand.vmem [shape: f32[128,32], index: 1, kind: input, shape index: {}]   ;;  %s434_s2 = inlined_call_operand.vmem [shape: f32[1,128], index: 2, kind: input, shape index: {}]   ;;  %s435_s3 = inlined_call_operand.hbm [shape: f32[8,128], index: 3, kind: output, shape index: {}]  }
   0x1   :  { %v16_v0 = vld [vmem:[%s433_s1] sm:$0xff]  ;;  %v17_v1 = vld [vmem:[%s433_s1 + $0x8] sm:$0xff]  ;;  %255 = vmatprep.subr.bf16.mxu0 %v319_v2  ;;  %vm351_vm1 = vmpackc.low %vm39_vm0, %vm39_vm0  ;;  %252 = vmatprep.mubr.msk.f32.mxu0 %vm320_vm2, %v321_v5 }
   0x2   :  { %v256_v3 = vpack.c.bf16 %v17_v1, %v16_v0  ;;  %v18_v6 = vld [vmem:[%s433_s1 + $0x10] sm:$0xff]  ;;  %v19_v7 = vld [vmem:[%s433_s1 + $0x18] sm:$0xff] }
   0x4   :  { %258 = vmatpush3.bf16.xpose.msk.msra.mxu0 %vm351_vm1, %v256_v3 }
   0x5   :  { %259 = vmatprep.subr.bf16.mxu0 %v319_v2 }
   0x6   :  { %8 = vsyncpa [#allocation3], 0  ;;  %v260_v8 = vpack.c.bf16 %v19_v7, %v18_v6  ;;  %v20_v9 = vld [vmem:[%s433_s1 + $0x20] sm:$0xff]  ;;  %v21_v10 = vld [vmem:[%s433_s1 + $0x28] sm:$0xff] }
   0x7   :  { %v264_v11 = vpack.c.bf16 %v21_v10, %v20_v9  ;;  %v22_v12 = vld [vmem:[%s433_s1 + $0x30] sm:$0xff]  ;;  %v23_v13 = vld [vmem:[%s433_s1 + $0x38] sm:$0xff]  ;;  %v24_v15 = vld [vmem:[%s433_s1 + $0x40] sm:$0xff] }
   0x8   :  { %v268_v14 = vpack.c.bf16 %v23_v13, %v22_v12  ;;  %v25_v16 = vld [vmem:[%s433_s1 + $0x48] sm:$0xff]  ;;  %v26_v18 = vld [vmem:[%s433_s1 + $0x50] sm:$0xff]  ;;  %v27_v19 = vld [vmem:[%s433_s1 + $0x58] sm:$0xff] }
   0x9   :  { %v272_v17 = vpack.c.bf16 %v25_v16, %v24_v15  ;;  %v276_v20 = vpack.c.bf16 %v27_v19, %v26_v18  ;;  %v28_v21 = vld [vmem:[%s433_s1 + $0x60] sm:$0xff]  ;;  %v29_v22 = vld [vmem:[%s433_s1 + $0x68] sm:$0xff]  ;;  %v30_v24 = vld [vmem:[%s433_s1 + $0x70] sm:$0xff] }
   0xa   :  { %v280_v23 = vpack.c.bf16 %v29_v22, %v28_v21  ;;  %v31_v25 = vld [vmem:[%s433_s1 + $0x78] sm:$0xff]  ;;  %v15_v27 = vld [vmem:[%s432_s0] sm:$0xff]  ;;  %s322_s1 = smov [#allocation2]  }
   0xb   :  { %v284_v26 = vpack.c.bf16 %v31_v25, %v30_v24  ;;  %v185_v28 = vld [vmem:[%s434_s2] ss:$0 sm:$0xff]  ;;  %s177_s0 = sshll.u32 %s322_s1, 4  ;;  %s178_s0 = int_to_ptr.vmem [resolvable:$true] %s177_s0 }
   0xc   :  { %262 = vmatpush3.bf16.xpose.msk.msra.mxu0 %vm351_vm1, %v260_v8  ;;  %s295_s21 = scalar_lea.vmem %s178_s0, 128  ;;  %p300_p1 = scmp.lt.s32.totalorder %s178_s0, %s178_s0 }
   0xd   :  { %263 = vmatprep.subr.bf16.mxu0 %v319_v2  ;;  %p296_p0 = scmp.ne.s32.totalorder %s178_s0, %s295_s21  ;;  %p301_p2 = scmp.lt.s32.totalorder %s295_s21, %s295_s21 }
   0xf   :  { %p302_p3 = por %p301_p2, %p300_p1 }
  0x11   :  { %p303_p4 = pnand %p302_p3, %p296_p0 }
  0x14   :  { %266 = vmatpush3.bf16.xpose.msk.msra.mxu0 %vm351_vm1, %v264_v11 }
  0x15   :  { %267 = vmatprep.subr.bf16.mxu0 %v319_v2 }
  0x1c   :  { %270 = vmatpush3.bf16.xpose.msk.msra.mxu0 %vm351_vm1, %v268_v14 }
  0x1d   :  { %271 = vmatprep.subr.bf16.mxu0 %v319_v2 }
  0x24   :  { %274 = vmatpush3.bf16.xpose.msk.msra.mxu0 %vm351_vm1, %v272_v17 }
  0x25   :  { %275 = vmatprep.subr.bf16.mxu0 %v319_v2 }
  0x2c   :  { %278 = vmatpush3.bf16.xpose.msk.msra.mxu0 %vm351_vm1, %v276_v20 }
  0x2d   :  { %279 = vmatprep.subr.bf16.mxu0 %v319_v2 }
  0x34   :  { %282 = vmatpush3.bf16.xpose.msk.msra.mxu0 %vm351_vm1, %v280_v23 }
  0x35   :  { %283 = vmatprep.subr.bf16.mxu0 %v319_v2 }
  0x3c   :  { %286 = vmatpush3.bf16.xpose.msk.msra.mxu0 %vm351_vm1, %v284_v26 }
  0x43   :  { %253 = vmatmul.mubr.msk.f32.vlgmr.msra.gmra.mrb[0].mxu0 %vm39_vm0, %v15_v27 }
 0x116   :  { %v157_v29 = vpop.f32.mrb[0].mxu0 }
 0x117   :  { %v158_v30 = vadd.f32 %v185_v28, %v157_v29  ;;  %v254_v31 = vpop.f32.mrb[1].mxu0 }
 0x119   :  { %161 = vmax.xlane.f32.xlu0 %v158_v30 }
 0x1a6   :  { %v162_v32 = vpop.xlane.xlu0 %161 }
 0x1a7   :  { %v163_v33 = vsub.f32 %v158_v30, %v162_v32 }
 0x1a9   :  { %v164_v34 = vmul.f32 1.442695, %v163_v33 }
 0x1ab   :  { %291 = vpow2.f32 %v164_v34 }
 0x1b5   :  { %v292_v35 = vpop.eup %291 }
 0x1b6   :  { %166 = vadd.xlane.f32.xlu0 %v292_v35 }
 0x243   :  { %v167_v36 = vpop.xlane.xlu0 %166 }
 0x244   :  { %293 = vrcp.f32 %v167_v36 }
 0x24e   :  { %v294_v37 = vpop.eup %293 }
 0x24f   :  { %v169_v38 = vmul.f32 %v294_v37, %v292_v35 }
 0x251   :  { %170 = vst [vmem:[#allocation2] sm:$0xff] %v169_v38 }
 0x252   :  { %306 = shalt.err (!%p303_p4)
}
 0x253   :  { %s307_s23 = scalar_lea.hbm %s435_s3, 128 }
 0x254   :  { %p308_p5 = scmp.ne.s32.totalorder %s435_s3, %s307_s23  ;;  %p311_p6 = scmp.lt.u32.totalorder %s307_s23, %s435_s3 }
 0x256   :  { %p313_p7 = pnand %p311_p6, %p308_p5 }
 0x258   :  { %316 = shalt.err (!%p313_p7)
}
 0x259   :  { %180 = dma.vmem_to_hbm [thread:$0]  %s178_s0, 128, %s435_s3, [#allocation3]  }
 0x25a   :  { %317 = dma.done.wait [#allocation3], 128  }
 0x25b   :  { %318 = vsyncadd [#allocation3], 4294967168 }
 0x25c   :  { %184 = vsyncpa [#allocation3], 1 }

</bundles_post_ra>
